<compile_context>
chip_gen: v6e
topology: v6e:2x2x1
jax: 0.10.0
libtpu: 0.0.40
codegen_flags: <defaults>
</compile_context>

<pallas_src>
import jax
import jax.numpy as jnp
from jax.experimental import pallas as pl
from jax.experimental.pallas import tpu as pltpu


_DEFAULT_CHUNK_THRESHOLD_BYTES = 4 * 1024 * 1024  # only chunk large copies
_DEFAULT_MAX_CHUNKS = 4                           # a few concurrent DMAs


def _chunk_bounds(dim0: int, max_chunks: int, granule: int):
    """Split [0, dim0) into <= max_chunks contiguous spans; every span start is
    a multiple of `granule` so HBM tile alignment is preserved."""
    per = -(-dim0 // max_chunks)            # ceil division
    per = -(-per // granule) * granule      # round span size up to granule
    bounds = []
    start = 0
    while start < dim0:
        size = min(per, dim0 - start)
        bounds.append((start, size))
        start += size
    return tuple(bounds)


def _make_copy_kernel(bounds):
    """bounds is None (single whole-array DMA) or a tuple of (start, size)
    spans along axis 0 (one DMA per span, all started before any wait)."""

    def kernel(x_hbm, o_hbm, sem):
        if bounds is None:
            cp = pltpu.make_async_copy(x_hbm, o_hbm, sem.at[0])
            cp.start()
            cp.wait()
        else:
            copies = []
            for idx, (start, size) in enumerate(bounds):
                cp = pltpu.make_async_copy(
                    x_hbm.at[pl.ds(start, size)],
                    o_hbm.at[pl.ds(start, size)],
                    sem.at[idx],
                )
                cp.start()
                copies.append(cp)
            for cp in copies:
                cp.wait()

    return kernel


def identity(x: jax.Array, *,
             allow_trivial_bypass: bool = False,
             max_chunks: int = _DEFAULT_MAX_CHUNKS,
             chunk_threshold_bytes: int = _DEFAULT_CHUNK_THRESHOLD_BYTES) -> jax.Array:
    """Pallas identity: returns a tensor equal to x (same shape & dtype)."""
    if x.size == 0:
        return x
    if allow_trivial_bypass:
        # nn.Identity returns its input unchanged; when the caller accepts
        # aliasing (donated buffers / tiny tensors) the optimal kernel is none.
        return x

    # Optional chunking along the leading axis: a few concurrent DMAs for big copies.
    bounds = None
    num_sems = 1
    if x.ndim >= 2 and x.nbytes >= chunk_threshold_bytes and max_chunks > 1:
        granule = 1 if x.ndim >= 3 else 32  # keep 2-D sublane tiles aligned
        if x.shape[0] >= 2 * granule:
            b = _chunk_bounds(x.shape[0], max_chunks, granule)
            if len(b) > 1:
                bounds = b
                num_sems = len(b)

    return pl.pallas_call(
        _make_copy_kernel(bounds),
        out_shape=jax.ShapeDtypeStruct(x.shape, x.dtype),
        in_specs=[pl.BlockSpec(memory_space=pl.ANY)],
        out_specs=pl.BlockSpec(memory_space=pl.ANY),
        scratch_shapes=[pltpu.SemaphoreType.DMA((num_sems,))],
        cost_estimate=pl.CostEstimate(
            flops=0, transcendentals=0, bytes_accessed=2 * x.nbytes),
    )(x)


if __name__ == "__main__":
    key = jax.random.PRNGKey(0)
    k0, k1, k2 = jax.random.split(key, 3)

    # (1) Conv-style NCHW input: single whole-array HBM->HBM DMA.
    x = jax.random.normal(k0, (2, 4, 16, 16), dtype=jnp.float32)
    y = identity(x)
    jax.block_until_ready(y)
    assert y.shape == x.shape and y.dtype == x.dtype
    assert bool(jnp.all(y == x))

    # (2) Odd, non-128-multiple shape: handled natively (no pad/slice passes).
    x_odd = jax.random.normal(k1, (3, 5, 7), dtype=jnp.float32)
    y_odd = identity(x_odd)
    jax.block_until_ready(y_odd)
    assert y_odd.shape == x_odd.shape and y_odd.dtype == x_odd.dtype
    assert bool(jnp.all(y_odd == x_odd))

    # (3) Exercise the chunked (multi-DMA) path on a small tensor by lowering
    #     the chunking threshold explicitly.
    x_big = jax.random.normal(k2, (8, 16, 128), dtype=jnp.float32)
    y_big = identity(x_big, chunk_threshold_bytes=0)
    jax.block_until_ready(y_big)
    assert y_big.shape == x_big.shape and y_big.dtype == x_big.dtype
    assert bool(jnp.all(y_big == x_big))

    print("KERNEL_OK")
</pallas_src>

<mosaic_0001>
module attributes {stable_mosaic.version = 11 : i64} {
  func.func @kernel(%arg0: memref<2x4x16x16xf32, #tpu.memory_space<any>>, %arg1: memref<2x4x16x16xf32, #tpu.memory_space<any>>, %arg2: memref<1x!tpu.dma_semaphore, #tpu.memory_space<semaphore_mem>>) attributes {dimension_semantics = [], scalar_prefetch = 0 : i64, scratch_operands = 1 : i64, tpu.core_type = #tpu.core_type<tc>} {
    %c0_i32 = arith.constant 0 : i32
    %0 = tpu.memref_slice %arg2[%c0_i32] : memref<1x!tpu.dma_semaphore, #tpu.memory_space<semaphore_mem>> -> memref<1x!tpu.dma_semaphore, #tpu.memory_space<semaphore_mem>>
    %1 = tpu.memref_squeeze %0 : memref<1x!tpu.dma_semaphore, #tpu.memory_space<semaphore_mem>> -> memref<!tpu.dma_semaphore, #tpu.memory_space<semaphore_mem>>
    tpu.enqueue_dma source(%arg0 : memref<2x4x16x16xf32, #tpu.memory_space<any>>) target(%arg1 : memref<2x4x16x16xf32, #tpu.memory_space<any>>) target_semaphore(%1 : memref<!tpu.dma_semaphore, #tpu.memory_space<semaphore_mem>>)
    %c0_i32_0 = arith.constant 0 : i32
    %2 = tpu.memref_slice %arg2[%c0_i32_0] : memref<1x!tpu.dma_semaphore, #tpu.memory_space<semaphore_mem>> -> memref<1x!tpu.dma_semaphore, #tpu.memory_space<semaphore_mem>>
    %3 = tpu.memref_squeeze %2 : memref<1x!tpu.dma_semaphore, #tpu.memory_space<semaphore_mem>> -> memref<!tpu.dma_semaphore, #tpu.memory_space<semaphore_mem>>
    tpu.wait_dma2 semaphore(%3 : memref<!tpu.dma_semaphore, #tpu.memory_space<semaphore_mem>>) src(%arg0 : memref<2x4x16x16xf32, #tpu.memory_space<any>>) dst(%arg1 : memref<2x4x16x16xf32, #tpu.memory_space<any>>)
    return
  }
}

</mosaic_0001>

<bundles_post_ra>
// kernel: tpu_custom_call.1
= control target key start
LH: loop header
LB: loop body
LE: loop exit
PB: predicated region body
PF: predicated region fallthrough
CT: control target
= control target key end

     0   :  { %s30_s6 = smov [#allocation2]   ;;  %s31_s7 = smov 131072   ;;  %s49_s0 = inlined_call_operand.hbm [shape: f32[2,4,16,16], index: 0, kind: input, shape index: {}]   ;;  %s50_s1 = inlined_call_operand.hbm [shape: f32[2,4,16,16], index: 1, kind: output, shape index: {}]  }
   0x1   :  { %s32_s8 = smov 0  }
   0x2   :  { %12 = dma.general %s49_s0, 2048, %s50_s1, %s30_s6, %s31_s7, [#allocation4], %s32_s8, 0  }
   0x3   :  { %28 = dma.done.wait [#allocation2], 2048 }
   0x4   :  { %29 = vsyncadd [#allocation2], 4294965248 }
   0x5   :  { %18 = vsyncmov [#allocation2] }
   0x8   :  { %s19_s13 = vpop.sfrf %18 }
   0x9   :  { %p24_p0 = scmp.ne.s32.totalorder %s19_s13, 0 }
   0xb   :  { %23 = shalt.err (%p24_p0)  }

</bundles_post_ra>
